<compile_context>
chip_gen: v7x
topology: tpu7x:2x2x1
jax: 0.10.0
libtpu: 0.0.40
codegen_flags: <defaults>
</compile_context>

<pallas_src>
import jax
import jax.numpy as jnp
from jax.experimental import pallas as pl
from jax.experimental.pallas import tpu as pltpu


def svm_kernel(b_ref, x_ref, w_ref, o_ref):
    # x_ref: (TM, D) tile, w_ref: (1, D) row (replicated, same dtype as x),
    # b_ref: (1, 1) f32 in SMEM, o_ref: (1, TM) lane-dense output row.
    x = x_ref[...]
    w = w_ref[...]                                   # broadcast over sublanes
    y = jnp.sum(x * w, axis=-1, dtype=jnp.float32)   # VPU mul + XLU reduce, f32 accumulate
    o_ref[...] = (y + b_ref[0, 0]).reshape(o_ref.shape).astype(o_ref.dtype)


def _round_up(n, m):
    return ((n + m - 1) // m) * m


def _choose_tile_rows(B, D, itemsize):
    """Pick a batch tile (rows).

    VMEM footprint is budgeted with the lane-padded row width (last dim padded to a
    multiple of 128 lanes): a (tm, 32) f32 tile occupies tm*128*4 bytes of VMEM even
    though it only moves tm*32*4 bytes of HBM. Target ~12 MiB lane-padded per buffer
    so the double-buffered working set (~24 MiB) stays well inside every chip's VMEM
    (v7x per-TC: 64 MiB) while tiles are large enough to hide per-step overhead.
    """
    if B <= 128:
        # Tiny batch: single tile, rounded up to a sublane multiple.
        return max(8, _round_up(B, 8))

    lane_padded_row_bytes = _round_up(max(D, 1), 128) * itemsize
    target_tile_bytes = 12 * 1024 * 1024
    tm = max(128, (target_tile_bytes // lane_padded_row_bytes // 128) * 128)
    tm = min(tm, _round_up(B, 128))                  # no point tiling past the batch
    if B >= 256:
        # Guarantee >= 2 grid steps so the "parallel" batch axis gives both v7x
        # TensorCores work (harmless on single-TC chips).
        tm = min(tm, _round_up(pl.cdiv(B, 2), 128))
    return tm


def svm_forward(x, weight, bias, tile_rows=None):
    """x: (B, D), weight: (1, D) (PyTorch nn.Linear layout), bias: (1,) -> (B,)."""
    B, D = x.shape
    w = weight.reshape(1, D).astype(x.dtype)          # row layout; cast hoisted out of kernel
    b = bias.reshape(1, 1).astype(jnp.float32)        # scalar for SMEM

    tm = tile_rows if tile_rows is not None else _choose_tile_rows(B, D, x.dtype.itemsize)
    num_tiles = pl.cdiv(B, tm)

    out = pl.pallas_call(
        svm_kernel,
        out_shape=jax.ShapeDtypeStruct((num_tiles, tm), x.dtype),
        grid=(num_tiles,),
        in_specs=[
            pl.BlockSpec(memory_space=pltpu.MemorySpace.SMEM),   # bias (1, 1), whole array
            pl.BlockSpec((tm, D), lambda i: (i, 0)),             # x tile (ragged tail handled by Pallas)
            pl.BlockSpec((1, D), lambda i: (0, 0)),              # weight row, replicated
        ],
        out_specs=pl.BlockSpec((1, tm), lambda i: (i, 0)),       # lane-dense output row
        compiler_params=pltpu.CompilerParams(
            dimension_semantics=("parallel",),                   # shard batch across TCs (v7x)
            vmem_limit_bytes=48 * 1024 * 1024,                   # > v6e default, < v7x 64 MiB
        ),
    )(b, x, w)

    # Rows >= B of the output slab correspond to the ragged tail of the last tile
    # (garbage input rows) and are discarded here.
    return out.reshape(num_tiles * tm)[:B]                       # == fc(x).squeeze(1)


def _reference(x, weight, bias):
    return (x @ weight.T + bias)[:, 0]


if __name__ == "__main__":
    key = jax.random.PRNGKey(0)
    kx, kw, kb, kx2 = jax.random.split(key, 4)

    # Small shapes consistent with the module: batch=8, input_dim (n_mfcc) = 32.
    B, D = 8, 32
    x = jax.random.normal(kx, (B, D), dtype=jnp.float32)

    # nn.Linear default init U(-1/sqrt(D), 1/sqrt(D)), PyTorch weight layout (1, D).
    bound = 1.0 / jnp.sqrt(jnp.float32(D))
    weight = jax.random.uniform(kw, (1, D), minval=-bound, maxval=bound, dtype=jnp.float32)
    bias = jax.random.uniform(kb, (1,), minval=-bound, maxval=bound, dtype=jnp.float32)

    y = jax.block_until_ready(svm_forward(x, weight, bias))
    y_ref = _reference(x, weight, bias)
    assert y.shape == (B,)
    assert jnp.allclose(y, y_ref, atol=1e-5), (y, y_ref)

    # Second case: multi-tile grid with a ragged final block (no wrapper pad) and
    # lane-dense (1, 128) output rows.
    B2 = 1000
    x2 = jax.random.normal(kx2, (B2, D), dtype=jnp.float32)
    y2 = jax.block_until_ready(svm_forward(x2, weight, bias, tile_rows=128))
    y2_ref = _reference(x2, weight, bias)
    assert y2.shape == (B2,)
    assert jnp.allclose(y2, y2_ref, atol=1e-5)

    # Third case: default (auto) tile selection on an unaligned batch -> >= 2 tiles,
    # exercising the v7x two-TC path and partial-final-block reads.
    y3 = jax.block_until_ready(svm_forward(x2, weight, bias))
    assert y3.shape == (B2,)
    assert jnp.allclose(y3, y2_ref, atol=1e-5)

    print("KERNEL_OK")
</pallas_src>

<mosaic_0001>
module attributes {stable_mosaic.version = 11 : i64} {
  func.func @svm_kernel(%arg0: i32, %arg1: memref<1x1xf32, #tpu.memory_space<smem>>, %arg2: memref<8x32xf32, #tpu.memory_space<vmem>>, %arg3: memref<1x32xf32, #tpu.memory_space<vmem>>, %arg4: memref<1x8xf32, #tpu.memory_space<vmem>>) attributes {dimension_semantics = [#tpu.dimension_semantics<parallel>], iteration_bounds = array<i64: 1>, scalar_prefetch = 0 : i64, scratch_operands = 0 : i64, tpu.core_type = #tpu.core_type<tc>, window_params = [{transform_indices = @transform_0, window_bounds = array<i64: 1, 1>}, {transform_indices = @transform_1, window_bounds = array<i64: 8, 32>}, {pipeline_mode = #tpu.pipeline_mode<synchronous>, transform_indices = @transform_2, window_bounds = array<i64: 1, 32>}, {transform_indices = @transform_3, window_bounds = array<i64: 1, 8>}]} {
    %c0 = arith.constant 0 : index
    %c0_0 = arith.constant 0 : index
    %0 = vector.load %arg2[%c0, %c0_0] : memref<8x32xf32, #tpu.memory_space<vmem>>, vector<8x32xf32>
    %c0_1 = arith.constant 0 : index
    %c0_2 = arith.constant 0 : index
    %1 = vector.load %arg3[%c0_1, %c0_2] : memref<1x32xf32, #tpu.memory_space<vmem>>, vector<1x32xf32>
    %2 = vector.broadcast %1 : vector<1x32xf32> to vector<8x32xf32>
    %3 = arith.mulf %0, %2 : vector<8x32xf32>
    %cst = arith.constant dense<0.000000e+00> : vector<8xf32>
    %4 = vector.multi_reduction <add>, %3, %cst [1] : vector<8x32xf32> to vector<8xf32>
    %c0_3 = arith.constant 0 : index
    %c0_4 = arith.constant 0 : index
    %5 = memref.load %arg1[%c0_3, %c0_4] : memref<1x1xf32, #tpu.memory_space<smem>>
    %6 = vector.broadcast %5 : f32 to vector<8xf32>
    %7 = arith.addf %4, %6 : vector<8xf32>
    %8 = vector.shape_cast %7 : vector<8xf32> to vector<1x8xf32>
    %c0_5 = arith.constant 0 : index
    %c0_6 = arith.constant 0 : index
    %9 = vector.load %arg4[%c0_5, %c0_6] : memref<1x8xf32, #tpu.memory_space<vmem>>, vector<1x8xf32>
    tpu.vector_store %arg4[%c0_5, %c0_6], %8 {strides = array<i32>} : memref<1x8xf32, #tpu.memory_space<vmem>>, vector<1x8xf32>,
    return
  }
  func.func @transform_0(%arg0: i32) -> (i32, i32) {
    %c0_i32 = arith.constant 0 : i32
    %c0_i32_0 = arith.constant 0 : i32
    %c0_i32_1 = arith.constant 0 : i32
    return %c0_i32, %c0_i32_0 : i32, i32
  }
  func.func @transform_1(%arg0: i32) -> (i32, i32) {
    %c0_i32 = arith.constant 0 : i32
    %c0_i32_0 = arith.constant 0 : i32
    return %arg0, %c0_i32 : i32, i32
  }
  func.func @transform_2(%arg0: i32) -> (i32, i32) {
    %c0_i32 = arith.constant 0 : i32
    %c0_i32_0 = arith.constant 0 : i32
    %c0_i32_1 = arith.constant 0 : i32
    return %c0_i32, %c0_i32_0 : i32, i32
  }
  func.func @transform_3(%arg0: i32) -> (i32, i32) {
    %c0_i32 = arith.constant 0 : i32
    %c0_i32_0 = arith.constant 0 : i32
    return %arg0, %c0_i32 : i32, i32
  }
}

</mosaic_0001>

<bundles_post_ra>
// kernel: tpu_custom_call.1
= control target key start
LH: loop header
LB: loop body
LE: loop exit
PB: predicated region body
PF: predicated region fallthrough
CT: control target
= control target key end

     0   :  { %9 = vsyncpa [#allocation4], 0  ;;  %s172_s0 = inlined_call_operand.<no memory space> [shape: f32[1,1], index: 0, kind: input, shape index: {}]   ;;  %s173_s1 = inlined_call_operand.hbm [shape: f32[8,32], index: 1, kind: input, shape index: {}]   ;;  %s174_s2 = inlined_call_operand.vmem [shape: f32[1,32], index: 2, kind: input, shape index: {}]   ;;  %s175_s3 = inlined_call_operand.hbm [shape: f32[1,8], index: 3, kind: output, shape index: {}]  }
   0x1   :  { %10 = vsyncpa [#allocation5], 0  ;;  %s120_s12 = smov [#allocation3]   ;;  %s72_s16 = scalar_lea.hbm %s173_s1, 128 }
   0x2   :  { %s19_s13 = sshll.u32 %s120_s12, 4  ;;  %p73_p0 = scmp.ne.s32.totalorder %s173_s1, %s72_s16  ;;  %s20_s13 = int_to_ptr.vmem [resolvable:$true] %s19_s13 }
   0x3   :  { %p76_p1 = scmp.lt.u32.totalorder %s72_s16, %s173_s1 }
   0x5   :  { %p78_p2 = pnand %p76_p1, %p73_p0 }
   0x7   :  { %81 = shalt.err (!%p78_p2)
}
   0x8   :  { %s82_s21 = scalar_lea.vmem %s20_s13, 128  ;;  %p87_p4 = scmp.lt.s32.totalorder %s20_s13, %s20_s13 }
   0x9   :  { %p83_p3 = scmp.ne.s32.totalorder %s20_s13, %s82_s21  ;;  %p88_p5 = scmp.lt.s32.totalorder %s82_s21, %s82_s21 }
   0xb   :  { %p89_p6 = por %p88_p5, %p87_p4 }
   0xd   :  { %p90_p7 = pnand %p89_p6, %p83_p3 }
   0xf   :  { %93 = shalt.err (!%p90_p7)
}
  0x10   :  { %22 = dma.hbm_to_vmem [thread:$0]  %s173_s1, 128, %s20_s13, [#allocation4]  }
  0x11   :  { %116 = dma.done.wait [#allocation4], 128  }
  0x12   :  { %117 = vsyncadd [#allocation4], 4294967168  ;;  %v28_v0 = vld [vmem:[#allocation3] sm:$0xff]  ;;  %vm37_vm0 = vcmask 261120   ;;  %v45_v4 = vlaneseq  ;;  %v42_v7 = vstv %s172_s0  ;;  %s121_s1 = smov [#allocation6]   ;;  %vm52_vm1 = vcmask 57344  }
  0x13   :  { %v69_v1 = vld [vmem:[%s174_s2] ss:$0 sm:$0xff]  ;;  %s60_s28 = sshll.u32 %s121_s1, 4  ;;  %s61_s28 = int_to_ptr.vmem [resolvable:$true] %s60_s28 }
  0x14   :  { %v36_v2 = vmul.f32 %v69_v1, %v28_v0  ;;  %v46_v5 = vand.u32 127, %v45_v4  ;;  %v48_v6 = vshrl.u32 %v45_v4, 7  ;;  %s94_s2 = scalar_lea.vmem %s61_s28, 16  ;;  %s98_s29 = scalar_lea.vmem %s61_s28, 32 }
  0x15   :  { %p95_p8 = scmp.ne.s32.totalorder %s61_s28, %s94_s2  ;;  %p99_p9 = scmp.lt.s32.totalorder %s61_s28, %s61_s28 }
  0x16   :  { %v38_v3 = vsel %vm37_vm0, %v36_v2, 0.0  ;;  %v49_v8 = vsub.s32 %v46_v5, %v48_v6  ;;  %p100_p10 = scmp.lt.s32.totalorder %s98_s29, %s94_s2 }
  0x17   :  { %39 = vadd.xlane.f32.xlu0 %v38_v3 }
  0x18   :  { %p101_p11 = por %p100_p10, %p99_p9 }
  0x1a   :  { %p102_p12 = pnand %p101_p11, %p95_p8 }
  0xa4   :  { %v40_v9 = vpop.xlane.xlu0 %39 }
  0xa5   :  { %v43_v10 = vadd.f32 %v42_v7, %v40_v9 }
  0xa7   :  { %v50_v11 = vrot.slane %v43_v10, %v49_v8 }
  0xa9   :  { %53 = vst.msk [vmem:[#allocation6] sm:$0x1] %vm52_vm1, %v50_v11 }
  0xaa   :  { %105 = shalt.err (!%p102_p12)
}
  0xab   :  { %s106_s0 = scalar_lea.hbm %s175_s3, 16 }
  0xac   :  { %p107_p13 = scmp.ne.s32.totalorder %s175_s3, %s106_s0  ;;  %p110_p0 = scmp.lt.u32.totalorder %s106_s0, %s175_s3 }
  0xae   :  { %p112_p1 = pnand %p110_p0, %p107_p13 }
  0xb0   :  { %115 = shalt.err (!%p112_p1)
}
  0xb1   :  { %63 = dma.vmem_to_hbm [thread:$0]  %s61_s28, 16, %s175_s3, [#allocation5]  }
  0xb2   :  { %118 = dma.done.wait [#allocation5], 16  }
  0xb3   :  { %119 = vsyncadd [#allocation5], 4294967280 }
  0xb4   :  { %67 = vsyncpa [#allocation4], 1 }
  0xb5   :  { %68 = vsyncpa [#allocation5], 1 }

</bundles_post_ra>
